<compile_context>
chip_gen: v7x
topology: tpu7x:2x2x1
jax: 0.10.0
libtpu: 0.0.40
codegen_flags: <defaults>
</compile_context>

<pallas_src>
import functools

import jax
import jax.numpy as jnp
from jax.experimental import pallas as pl
from jax.experimental.pallas import tpu as pltpu


def _round_up(n: int, m: int) -> int:
    return (n + m - 1) // m * m


def _disc_mlp_kernel(b3_ref,                      # scalar prefetch (SMEM), (1,)
                     xs_ref, xa_ref,              # (tm, S), (tm, A)
                     w1s_ref, w1a_ref, b1_ref,    # (S, H1p), (A, H1p), (1, H1p)
                     w2_ref, b2_ref,              # (H1p, H2p), (1, H2p)
                     w3_ref,                      # (1, H2p)  final weights as a row
                     o_ref):                      # (tm, 1)
    """Full discriminator MLP forward on one batch tile.

    The whole x -> h1 -> h2 -> logits chain stays in VMEM / vregs.
    Matmul accumulation, bias adds and tanh are done in float32; if the
    weight refs are bf16 the MXU is fed bf16 operands.
    """
    # Layer 1: split-input matmul (states / actions DMA'd separately, no concat).
    z1 = (jnp.dot(xs_ref[...], w1s_ref[...], preferred_element_type=jnp.float32)
          + jnp.dot(xa_ref[...], w1a_ref[...], preferred_element_type=jnp.float32)
          + b1_ref[...])                                            # (tm, H1p) f32
    h1 = jnp.tanh(z1)

    # Layer 2: cast activation to the weight dtype (bf16 on the fast path) for
    # the MXU, accumulate in f32.
    z2 = (jnp.dot(h1.astype(w2_ref.dtype), w2_ref[...],
                  preferred_element_type=jnp.float32)
          + b2_ref[...])                                            # (tm, H2p) f32
    h2 = jnp.tanh(z2)

    # Layer 3 (out_features == 1): VPU multiply + lane reduction instead of an
    # N=1 MXU matmul; b3 comes from SMEM as a scalar.
    logits = jnp.sum(h2 * w3_ref[...], axis=-1, keepdims=True) + b3_ref[0]

    # TODO(synk): if profiling shows vst.msk pressure, emit a lane-dense
    # (grid, tm) output slab instead of the (tm, 1) block.
    o_ref[...] = logits.astype(o_ref.dtype)


_DEFAULT_MAX_TILE = 2048  # rows: keeps ~0.35us/step overhead <1% and VMEM tiny.


@functools.partial(jax.jit, static_argnames=("batch_tile", "use_bf16"))
def discriminator_forward(states, actions, params, *, batch_tile=None,
                          use_bf16=True):
    """Pallas-backed DiscriminatorNet.get_logits(states, actions).

    states:  (B, S) float32
    actions: (B, A) float32
    params:  dict with w1 (S+A, H1), b1 (1, H1), w2 (H1, H2), b2 (1, H2),
             w3 (H2, 1), b3 (1, 1)   (weights stored [in, out])
    returns logits (B, 1) float32.
    """
    w1, b1 = params["w1"], params["b1"]
    w2, b2 = params["w2"], params["b2"]
    w3, b3 = params["w3"], params["b3"]

    B, S = states.shape
    A = actions.shape[1]
    H1 = w1.shape[1]
    H2 = w2.shape[1]

    # --- lane padding: make hidden widths multiples of 128 (zero pads are
    # numerically inert for Linear+Tanh chains). -----------------------------
    H1p = _round_up(H1, 128)
    H2p = _round_up(H2, 128)

    w1s = jnp.pad(w1[:S], ((0, 0), (0, H1p - H1)))          # (S, H1p)
    w1a = jnp.pad(w1[S:], ((0, 0), (0, H1p - H1)))          # (A, H1p)
    b1p = jnp.pad(b1, ((0, 0), (0, H1p - H1)))              # (1, H1p)
    w2p = jnp.pad(w2, ((0, H1p - H1), (0, H2p - H2)))        # (H1p, H2p)
    b2p = jnp.pad(b2, ((0, 0), (0, H2p - H2)))              # (1, H2p)
    w3row = jnp.pad(w3.reshape(1, H2), ((0, 0), (0, H2p - H2)))  # (1, H2p)
    b3_flat = b3.reshape(1).astype(jnp.float32)             # SMEM scalar prefetch

    # --- batch tiling (multi-step grid -> pipelining + v7x megacore). --------
    if batch_tile is None:
        tm = min(_DEFAULT_MAX_TILE, _round_up(B, 8))
    else:
        tm = _round_up(int(batch_tile), 8)
    B_pad = _round_up(B, tm)
    if B_pad != B:
        states = jnp.pad(states, ((0, B_pad - B), (0, 0)))
        actions = jnp.pad(actions, ((0, B_pad - B), (0, 0)))

    # --- MXU input dtype. bf16 is the native MXU operand on v6e/v7x; tanh and
    # bias adds remain f32 inside the kernel (safe on v5e: no bf16 VPU/EUP). --
    if use_bf16:
        states = states.astype(jnp.bfloat16)
        actions = actions.astype(jnp.bfloat16)
        w1s = w1s.astype(jnp.bfloat16)
        w1a = w1a.astype(jnp.bfloat16)
        w2p = w2p.astype(jnp.bfloat16)

    grid = (B_pad // tm,)

    # Weights / biases are broadcast (same block every grid step); only the
    # activation rows are tiled over the batch axis.  Index maps receive the
    # scalar-prefetch ref as a trailing positional arg.
    def bcast(shape):
        return pl.BlockSpec(shape, lambda i, *_: (0, 0))

    out = pl.pallas_call(
        _disc_mlp_kernel,
        out_shape=jax.ShapeDtypeStruct((B_pad, 1), jnp.float32),
        grid_spec=pltpu.PrefetchScalarGridSpec(
            num_scalar_prefetch=1,
            grid=grid,
            in_specs=[
                pl.BlockSpec((tm, S), lambda i, *_: (i, 0)),   # states tile
                pl.BlockSpec((tm, A), lambda i, *_: (i, 0)),   # actions tile
                bcast((S, H1p)),                               # w1[:S]
                bcast((A, H1p)),                               # w1[S:]
                bcast((1, H1p)),                               # b1
                bcast((H1p, H2p)),                             # w2
                bcast((1, H2p)),                               # b2
                bcast((1, H2p)),                               # w3 as row
            ],
            out_specs=pl.BlockSpec((tm, 1), lambda i, *_: (i, 0)),
        ),
        compiler_params=pltpu.CompilerParams(
            dimension_semantics=("parallel",)),
    )(b3_flat, states, actions, w1s, w1a, b1p, w2p, b2p, w3row)

    return out[:B]


def init_params(key, input_dim, hidden_sizes=(64, 32)):
    """PyTorch nn.Linear-style init: U(-1/sqrt(fan_in), 1/sqrt(fan_in)).

    Weights are stored [in, out] (transposed vs. torch) so the kernel can do
    x @ W directly.
    """
    sizes = [input_dim] + list(hidden_sizes) + [1]
    params = {}
    for idx in range(len(sizes) - 1):
        fan_in, fan_out = sizes[idx], sizes[idx + 1]
        key, kw, kb = jax.random.split(key, 3)
        bound = 1.0 / jnp.sqrt(jnp.float32(fan_in))
        params[f"w{idx + 1}"] = jax.random.uniform(
            kw, (fan_in, fan_out), jnp.float32, -bound, bound)
        params[f"b{idx + 1}"] = jax.random.uniform(
            kb, (1, fan_out), jnp.float32, -bound, bound)
    return params


def reference_forward(states, actions, params):
    """Plain-JAX reference mirroring DiscriminatorNet.get_logits."""
    x = jnp.concatenate([states, actions], axis=-1)
    h = jnp.tanh(x @ params["w1"] + params["b1"])
    h = jnp.tanh(h @ params["w2"] + params["b2"])
    return h @ params["w3"] + params["b3"]


if __name__ == "__main__":
    # Module-consistent small shapes:
    #   env_dim = {'states': 24, 'actions': 8} -> input_size = 32
    #   hidden_sizes = (64, 32), activation = Tanh, no diffusion.
    STATES, ACTIONS = 24, 8
    HIDDEN = (64, 32)
    BATCH = 8

    key = jax.random.PRNGKey(0)
    key, k_s, k_a = jax.random.split(key, 3)
    states = jax.random.normal(k_s, (BATCH, STATES), jnp.float32)
    actions = jax.random.normal(k_a, (BATCH, ACTIONS), jnp.float32)

    params = init_params(key, STATES + ACTIONS, HIDDEN)
    ref = reference_forward(states, actions, params)

    # 1) exact f32 path.
    logits_f32 = jax.block_until_ready(
        discriminator_forward(states, actions, params, use_bf16=False))
    assert logits_f32.shape == (BATCH, 1)
    assert jnp.allclose(logits_f32, ref, atol=1e-4, rtol=1e-4), (
        "f32 Pallas kernel output mismatch vs reference")

    # 2) bf16-MXU fast path (default) — relaxed tolerance per bf16 operands.
    logits_bf16 = jax.block_until_ready(
        discriminator_forward(states, actions, params))
    assert logits_bf16.shape == (BATCH, 1)
    assert jnp.allclose(logits_bf16, ref, atol=5e-2, rtol=5e-2), (
        "bf16 Pallas kernel output mismatch vs reference")

    # 3) multi-step grid with ragged batch (exercises batch tiling + padding).
    BIG = 300
    key, k_s2, k_a2 = jax.random.split(key, 3)
    states_b = jax.random.normal(k_s2, (BIG, STATES), jnp.float32)
    actions_b = jax.random.normal(k_a2, (BIG, ACTIONS), jnp.float32)
    logits_b = jax.block_until_ready(
        discriminator_forward(states_b, actions_b, params,
                              batch_tile=128, use_bf16=False))
    ref_b = reference_forward(states_b, actions_b, params)
    assert logits_b.shape == (BIG, 1)
    assert jnp.allclose(logits_b, ref_b, atol=1e-4, rtol=1e-4), (
        "tiled Pallas kernel output mismatch vs reference")

    print("KERNEL_OK")
</pallas_src>

<mosaic_0001>
module attributes {stable_mosaic.version = 11 : i64} {
  func.func @_disc_mlp_kernel(%arg0: i32, %arg1: memref<1xf32, #tpu.memory_space<smem>>, %arg2: memref<8x24xf32, #tpu.memory_space<vmem>>, %arg3: memref<8x8xf32, #tpu.memory_space<vmem>>, %arg4: memref<24x128xf32, #tpu.memory_space<vmem>>, %arg5: memref<8x128xf32, #tpu.memory_space<vmem>>, %arg6: memref<1x128xf32, #tpu.memory_space<vmem>>, %arg7: memref<128x128xf32, #tpu.memory_space<vmem>>, %arg8: memref<1x128xf32, #tpu.memory_space<vmem>>, %arg9: memref<1x128xf32, #tpu.memory_space<vmem>>, %arg10: memref<8x1xf32, #tpu.memory_space<vmem>>) attributes {dimension_semantics = [#tpu.dimension_semantics<parallel>], iteration_bounds = array<i64: 1>, scalar_prefetch = 1 : i64, scratch_operands = 0 : i64, tpu.core_type = #tpu.core_type<tc>, window_params = [{transform_indices = @transform_0, window_bounds = array<i64: 8, 24>}, {transform_indices = @transform_1, window_bounds = array<i64: 8, 8>}, {pipeline_mode = #tpu.pipeline_mode<synchronous>, transform_indices = @transform_2, window_bounds = array<i64: 24, 128>}, {pipeline_mode = #tpu.pipeline_mode<synchronous>, transform_indices = @transform_3, window_bounds = array<i64: 8, 128>}, {pipeline_mode = #tpu.pipeline_mode<synchronous>, transform_indices = @transform_4, window_bounds = array<i64: 1, 128>}, {pipeline_mode = #tpu.pipeline_mode<synchronous>, transform_indices = @transform_5, window_bounds = array<i64: 128, 128>}, {pipeline_mode = #tpu.pipeline_mode<synchronous>, transform_indices = @transform_6, window_bounds = array<i64: 1, 128>}, {pipeline_mode = #tpu.pipeline_mode<synchronous>, transform_indices = @transform_7, window_bounds = array<i64: 1, 128>}, {transform_indices = @transform_8, window_bounds = array<i64: 8, 1>}]} {
    %c0 = arith.constant 0 : index
    %c0_0 = arith.constant 0 : index
    %0 = vector.load %arg2[%c0, %c0_0] : memref<8x24xf32, #tpu.memory_space<vmem>>, vector<8x24xf32>
    %c0_1 = arith.constant 0 : index
    %c0_2 = arith.constant 0 : index
    %1 = vector.load %arg4[%c0_1, %c0_2] : memref<24x128xf32, #tpu.memory_space<vmem>>, vector<24x128xf32>
    %cst = arith.constant dense<0.000000e+00> : vector<8x128xf32>
    %2 = tpu.matmul %0, %1, %cst {dimension_numbers = #tpu.dot_dimension_numbers<[1], [0], [0], [1], [0, 0, 1, 1], [], []>} : vector<8x24xf32>, vector<24x128xf32>, vector<8x128xf32> -> vector<8x128xf32>
    %c0_3 = arith.constant 0 : index
    %c0_4 = arith.constant 0 : index
    %3 = vector.load %arg3[%c0_3, %c0_4] : memref<8x8xf32, #tpu.memory_space<vmem>>, vector<8x8xf32>
    %c0_5 = arith.constant 0 : index
    %c0_6 = arith.constant 0 : index
    %4 = vector.load %arg5[%c0_5, %c0_6] : memref<8x128xf32, #tpu.memory_space<vmem>>, vector<8x128xf32>
    %cst_7 = arith.constant dense<0.000000e+00> : vector<8x128xf32>
    %5 = tpu.matmul %3, %4, %cst_7 {dimension_numbers = #tpu.dot_dimension_numbers<[1], [0], [0], [1], [0, 0, 1, 1], [], []>} : vector<8x8xf32>, vector<8x128xf32>, vector<8x128xf32> -> vector<8x128xf32>
    %6 = arith.addf %2, %5 : vector<8x128xf32>
    %c0_8 = arith.constant 0 : index
    %c0_9 = arith.constant 0 : index
    %7 = vector.load %arg6[%c0_8, %c0_9] : memref<1x128xf32, #tpu.memory_space<vmem>>, vector<1x128xf32>
    %8 = vector.broadcast %7 : vector<1x128xf32> to vector<8x128xf32>
    %9 = arith.addf %6, %8 : vector<8x128xf32>
    %10 = math.tanh %9 : vector<8x128xf32>
    %c0_10 = arith.constant 0 : index
    %c0_11 = arith.constant 0 : index
    %11 = vector.load %arg7[%c0_10, %c0_11] : memref<128x128xf32, #tpu.memory_space<vmem>>, vector<128x128xf32>
    %cst_12 = arith.constant dense<0.000000e+00> : vector<8x128xf32>
    %12 = tpu.matmul %10, %11, %cst_12 {dimension_numbers = #tpu.dot_dimension_numbers<[1], [0], [0], [1], [0, 0, 1, 1], [], []>} : vector<8x128xf32>, vector<128x128xf32>, vector<8x128xf32> -> vector<8x128xf32>
    %c0_13 = arith.constant 0 : index
    %c0_14 = arith.constant 0 : index
    %13 = vector.load %arg8[%c0_13, %c0_14] : memref<1x128xf32, #tpu.memory_space<vmem>>, vector<1x128xf32>
    %14 = vector.broadcast %13 : vector<1x128xf32> to vector<8x128xf32>
    %15 = arith.addf %12, %14 : vector<8x128xf32>
    %16 = math.tanh %15 : vector<8x128xf32>
    %c0_15 = arith.constant 0 : index
    %c0_16 = arith.constant 0 : index
    %17 = vector.load %arg9[%c0_15, %c0_16] : memref<1x128xf32, #tpu.memory_space<vmem>>, vector<1x128xf32>
    %18 = vector.broadcast %17 : vector<1x128xf32> to vector<8x128xf32>
    %19 = arith.mulf %16, %18 : vector<8x128xf32>
    %cst_17 = arith.constant dense<0.000000e+00> : vector<8xf32>
    %20 = vector.multi_reduction <add>, %19, %cst_17 [1] : vector<8x128xf32> to vector<8xf32>
    %21 = vector.shape_cast %20 : vector<8xf32> to vector<8x1xf32>
    %c0_18 = arith.constant 0 : index
    %22 = memref.load %arg1[%c0_18] : memref<1xf32, #tpu.memory_space<smem>>
    %23 = vector.broadcast %22 : f32 to vector<8x1xf32>
    %24 = arith.addf %21, %23 : vector<8x1xf32>
    %c0_19 = arith.constant 0 : index
    %c0_20 = arith.constant 0 : index
    %25 = vector.load %arg10[%c0_19, %c0_20] : memref<8x1xf32, #tpu.memory_space<vmem>>, vector<8x1xf32>
    tpu.vector_store %arg10[%c0_19, %c0_20], %24 {strides = array<i32>} : memref<8x1xf32, #tpu.memory_space<vmem>>, vector<8x1xf32>,
    return
  }
  func.func @transform_0(%arg0: i32, %arg1: memref<1xf32, #tpu.memory_space<smem>>) -> (i32, i32) {
    %c0_i32 = arith.constant 0 : i32
    %c0_i32_0 = arith.constant 0 : i32
    return %arg0, %c0_i32 : i32, i32
  }
  func.func @transform_1(%arg0: i32, %arg1: memref<1xf32, #tpu.memory_space<smem>>) -> (i32, i32) {
    %c0_i32 = arith.constant 0 : i32
    %c0_i32_0 = arith.constant 0 : i32
    return %arg0, %c0_i32 : i32, i32
  }
  func.func @transform_2(%arg0: i32, %arg1: memref<1xf32, #tpu.memory_space<smem>>) -> (i32, i32) {
    %c0_i32 = arith.constant 0 : i32
    %c0_i32_0 = arith.constant 0 : i32
    %c0_i32_1 = arith.constant 0 : i32
    return %c0_i32, %c0_i32_0 : i32, i32
  }
  func.func @transform_3(%arg0: i32, %arg1: memref<1xf32, #tpu.memory_space<smem>>) -> (i32, i32) {
    %c0_i32 = arith.constant 0 : i32
    %c0_i32_0 = arith.constant 0 : i32
    %c0_i32_1 = arith.constant 0 : i32
    return %c0_i32, %c0_i32_0 : i32, i32
  }
  func.func @transform_4(%arg0: i32, %arg1: memref<1xf32, #tpu.memory_space<smem>>) -> (i32, i32) {
    %c0_i32 = arith.constant 0 : i32
    %c0_i32_0 = arith.constant 0 : i32
    %c0_i32_1 = arith.constant 0 : i32
    return %c0_i32, %c0_i32_0 : i32, i32
  }
  func.func @transform_5(%arg0: i32, %arg1: memref<1xf32, #tpu.memory_space<smem>>) -> (i32, i32) {
    %c0_i32 = arith.constant 0 : i32
    %c0_i32_0 = arith.constant 0 : i32
    %c0_i32_1 = arith.constant 0 : i32
    return %c0_i32, %c0_i32_0 : i32, i32
  }
  func.func @transform_6(%arg0: i32, %arg1: memref<1xf32, #tpu.memory_space<smem>>) -> (i32, i32) {
    %c0_i32 = arith.constant 0 : i32
    %c0_i32_0 = arith.constant 0 : i32
    %c0_i32_1 = arith.constant 0 : i32
    return %c0_i32, %c0_i32_0 : i32, i32
  }
  func.func @transform_7(%arg0: i32, %arg1: memref<1xf32, #tpu.memory_space<smem>>) -> (i32, i32) {
    %c0_i32 = arith.constant 0 : i32
    %c0_i32_0 = arith.constant 0 : i32
    %c0_i32_1 = arith.constant 0 : i32
    return %c0_i32, %c0_i32_0 : i32, i32
  }
  func.func @transform_8(%arg0: i32, %arg1: memref<1xf32, #tpu.memory_space<smem>>) -> (i32, i32) {
    %c0_i32 = arith.constant 0 : i32
    %c0_i32_0 = arith.constant 0 : i32
    return %arg0, %c0_i32 : i32, i32
  }
}

</mosaic_0001>

<bundles_post_ra>
// kernel: discriminator_forward.1
= control target key start
LH: loop header
LB: loop body
LE: loop exit
PB: predicated region body
PF: predicated region fallthrough
CT: control target
= control target key end

     0   :  { %vm37_vm0 = vcmask 64512   ;;  %v418_v0 = vmov 0.0   ;;  %vm419_vm1 = vmmov 0   ;;  %v420_v5 = vmov 0.0|0.0   ;;  %s555_s4 = inlined_call_operand.vmem [shape: f32[8,128], index: 4, kind: input, shape index: {}]   ;;  %s556_s2 = inlined_call_operand.vmem [shape: f32[8,8], index: 2, kind: input, shape index: {}]   ;;  %s557_s3 = inlined_call_operand.vmem [shape: f32[24,128], index: 3, kind: input, shape index: {}]   ;;  %s558_s6 = inlined_call_operand.vmem [shape: f32[128,128], index: 6, kind: input, shape index: {}]   ;;  %s559_s1 = inlined_call_operand.vmem [shape: f32[8,24], index: 1, kind: input, shape index: {}]   ;;  %s560_s5 = inlined_call_operand.vmem [shape: f32[1,128], index: 5, kind: input, shape index: {}]   ;;  %s561_s7 = inlined_call_operand.vmem [shape: f32[1,128], index: 7, kind: input, shape index: {}]   ;;  %s562_s8 = inlined_call_operand.vmem [shape: f32[1,128], index: 8, kind: input, shape index: {}]   ;;  %s563_s0 = inlined_call_operand.<no memory space> [shape: f32[1], index: 0, kind: input, shape index: {}]   ;;  %s564_s9 = inlined_call_operand.vmem [shape: f32[8,1], index: 9, kind: output, shape index: {}]  }
   0x1   :  { %335 = vmatprep.subr.mxu1 %v418_v0  ;;  %v36_v1 = vld [vmem:[%s555_s4] sm:$0xff]  ;;  %337 = vmatprep.mubr.msk.f32.mxu1 %vm419_vm1, %v418_v0  ;;  %v33_v4 = vld [vmem:[%s557_s3 + $0x8] sm:$0xff]  ;;  %v196_v9 = vld [vmem:[%s558_s6 + $0x10] sm:$0xff]  ;;  %vm111_vm2 = vcmask 195584   ;;  %v299_v48 = vstv %s563_s0  ;;  %vm301_vm3 = vcmask 7168  }
   0x2   :  { %v35_v2 = vld [vmem:[%s556_s2] sm:$0xff]  ;;  %336 = vmatpush3.msra.mxu1 %v36_v1  ;;  %387 = vmatprep.subr.bf16.mxu0 %v420_v5  ;;  %v195_v8 = vld [vmem:[%s558_s6 + $0x8] sm:$0xff]  ;;  %v197_v11 = vld [vmem:[%s558_s6 + $0x18] sm:$0xff] }
   0x3   :  { %v32_v3 = vld [vmem:[%s557_s3] sm:$0xff]  ;;  %338 = vmatmul.mubr.msk.f32.vlgmr.msra.gmra.mrb[0].mxu1 %vm37_vm0, %v35_v2  ;;  %384 = vmatprep.subr.bf16.mxu1 %v420_v5  ;;  %v34_v12 = vld [vmem:[%s557_s3 + $0x10] sm:$0xff]  ;;  %v391_v13 = vpack.c.bf16 %v197_v11, %v196_v9  ;;  %v199_v16 = vld [vmem:[%s558_s6 + $0x28] sm:$0xff] }
   0x4   :  { %v385_v6 = vpack.c.bf16 %v33_v4, %v32_v3  ;;  %v194_v7 = vld [vmem:[%s558_s6] sm:$0xff]  ;;  %346 = vmatprep.mubr.msk.f32.mxu1 %vm419_vm1, %v418_v0  ;;  %381 = vmatprep.mubr.msk.f32.mxu0 %vm419_vm1, %v418_v0  ;;  %v200_v18 = vld [vmem:[%s558_s6 + $0x30] sm:$0xff]  ;;  %v201_v19 = vld [vmem:[%s558_s6 + $0x38] sm:$0xff] }
   0x5   :  { %v388_v10 = vpack.c.bf16 %v195_v8, %v194_v7  ;;  %v31_v14 = vld [vmem:[%s559_s1] sm:$0xff]  ;;  %v397_v20 = vpack.c.bf16 %v201_v19, %v200_v18  ;;  %v203_v22 = vld [vmem:[%s558_s6 + $0x48] sm:$0xff]  ;;  %v204_v24 = vld [vmem:[%s558_s6 + $0x50] sm:$0xff] }
   0x6   :  { %386 = vmatpush3.bf16.msra.mxu1 %v385_v6  ;;  %v198_v15 = vld [vmem:[%s558_s6 + $0x20] sm:$0xff]  ;;  %v205_v25 = vld [vmem:[%s558_s6 + $0x58] sm:$0xff]  ;;  %v207_v28 = vld [vmem:[%s558_s6 + $0x68] sm:$0xff] }
   0x7   :  { %344 = vmatprep.subr.mxu1 %v418_v0  ;;  %389 = vmatpush3.bf16.msra.mxu0 %v388_v10  ;;  %v394_v17 = vpack.c.bf16 %v199_v16, %v198_v15  ;;  %v202_v21 = vld [vmem:[%s558_s6 + $0x40] sm:$0xff]  ;;  %v403_v26 = vpack.c.bf16 %v205_v25, %v204_v24  ;;  %v208_v30 = vld [vmem:[%s558_s6 + $0x70] sm:$0xff]  ;;  %v209_v31 = vld [vmem:[%s558_s6 + $0x78] sm:$0xff] }
   0x8   :  { %390 = vmatprep.subr.bf16.mxu0 %v420_v5  ;;  %v400_v23 = vpack.c.bf16 %v203_v22, %v202_v21  ;;  %v206_v27 = vld [vmem:[%s558_s6 + $0x60] sm:$0xff]  ;;  %v409_v32 = vpack.c.bf16 %v209_v31, %v208_v30 }
   0x9   :  { %v406_v29 = vpack.c.bf16 %v207_v28, %v206_v27  ;;  %v309_v36 = vld [vmem:[%s560_s5] ss:$0 sm:$0xff] }
   0xa   :  { %345 = vmatpush3.msra.mxu1 %v34_v12  ;;  %v310_v41 = vld [vmem:[%s561_s7] ss:$0 sm:$0xff] }
   0xb   :  { %347 = vmatmul.mubr.msk.f32.vlgmr.msra.gmra.mrb[2].mxu1 %vm111_vm2, %v31_v14  ;;  %392 = vmatpush3.bf16.msra.mxu0 %v391_v13  ;;  %v311_v45 = vld [vmem:[%s562_s8] ss:$0 sm:$0xff] }
   0xc   :  { %393 = vmatprep.subr.bf16.mxu0 %v420_v5 }
   0xf   :  { %395 = vmatpush3.bf16.msra.mxu0 %v394_v17 }
  0x10   :  { %396 = vmatprep.subr.bf16.mxu0 %v420_v5 }
  0x13   :  { %398 = vmatpush3.bf16.msra.mxu0 %v397_v20 }
  0x14   :  { %399 = vmatprep.subr.bf16.mxu0 %v420_v5 }
  0x17   :  { %401 = vmatpush3.bf16.msra.mxu0 %v400_v23 }
  0x18   :  { %402 = vmatprep.subr.bf16.mxu0 %v420_v5 }
  0x1b   :  { %404 = vmatpush3.bf16.msra.mxu0 %v403_v26 }
  0x1c   :  { %405 = vmatprep.subr.bf16.mxu0 %v420_v5 }
  0x1f   :  { %407 = vmatpush3.bf16.msra.mxu0 %v406_v29 }
  0x20   :  { %408 = vmatprep.subr.bf16.mxu0 %v420_v5 }
  0x23   :  { %410 = vmatpush3.bf16.msra.mxu0 %v409_v32 }
  0xd6   :  { %v107_v33 = vpop.f32.mrb[0].mxu1 }
  0xd7   :  { %v339_v34 = vpop.f32.mrb[1].mxu1 }
  0xde   :  { %v181_v35 = vpop.f32.mrb[2].mxu1 }
  0xdf   :  { %v182_v37 = vadd.f32 %v181_v35, %v107_v33  ;;  %v348_v38 = vpop.f32.mrb[3].mxu1 }
  0xe1   :  { %v192_v39 = vadd.f32 %v309_v36, %v182_v37 }
  0xe3   :  { %414 = vtanh.f32 %v192_v39 }
  0xed   :  { %v415_v40 = vpop.eup %414 }
  0xee   :  { %382 = vmatmul.mubr.f32.vlgmr.msra.gmra.mrb[0].mxu0 %v415_v40 }
 0x1c1   :  { %v283_v42 = vpop.f32.mrb[0].mxu0 }
 0x1c2   :  { %v284_v43 = vadd.f32 %v310_v41, %v283_v42  ;;  %v383_v44 = vpop.f32.mrb[1].mxu0 }
 0x1c4   :  { %416 = vtanh.f32 %v284_v43 }
 0x1ce   :  { %v417_v46 = vpop.eup %416 }
 0x1cf   :  { %v295_v47 = vmul.f32 %v417_v46, %v311_v45 }
 0x1d1   :  { %296 = vadd.xlane.f32.xlu0 %v295_v47 }
 0x25e   :  { %v297_v49 = vpop.xlane.xlu0 %296 }
 0x25f   :  { %v300_v50 = vadd.f32 %v299_v48, %v297_v49 }
 0x261   :  { %302 = vst.msk [vmem:[%s564_s9] sm:$0xff] %vm301_vm3, %v300_v50 }

</bundles_post_ra>
